<compile_context>
chip_gen: v6e
topology: v6e:2x2x1
jax: 0.10.0
libtpu: 0.0.40
codegen_flags: <defaults>
</compile_context>

<pallas_src>
import functools
import math

import jax
import jax.numpy as jnp
import numpy as np
from jax import lax
from jax.experimental import pallas as pl
from jax.experimental.pallas import tpu as pltpu

_MIB = 1024 * 1024
_MIN_GRID_STEPS = 4   # keep >= 2 independent grid steps per TensorCore on v7x (2 TCs/chip)


# ----------------------------------------------------------------------------
# Kernel
# ----------------------------------------------------------------------------
def _shift_with_zeros(x, s, axis):
    """Full-extent zero-filled shift of a loaded value along `axis` (static s).

    Returns None when the whole extent is shifted out of range (result is all zeros).
    """
    if s == 0:
        return x
    size = x.shape[axis]
    keep = size - abs(s)
    if keep <= 0:
        return None
    zshape = list(x.shape)
    zshape[axis] = abs(s)
    zeros = jnp.zeros(zshape, x.dtype)
    sl = [slice(None)] * x.ndim
    if s > 0:
        sl[axis] = slice(0, keep)
        return jnp.concatenate([zeros, x[tuple(sl)]], axis=axis)
    sl[axis] = slice(-s, size)
    return jnp.concatenate([x[tuple(sl)], zeros], axis=axis)


def _shifted_block_kernel(x_ref, o_ref, *, group_bounds, shifts, shift_axis,
                          select_combine):
    """Per-channel-group zero-filled shift along one spatial axis.

    x_ref / o_ref: (1, Hb, Wb, C) blocks in VMEM; the shifted spatial axis is always
    whole inside the block, so every shift below is a static offset.
    """
    blk = tuple(o_ref.shape)
    ndim = len(blk)
    cax = ndim - 1                      # channel (lane) axis
    size = blk[shift_axis]              # full extent of the shifted axis

    if select_combine:
        # Build the whole output block in registers and issue one dense store stream:
        # <=5 shifted views (outer-dim slices + zero concat -> no relayout, no masked
        # stores) are combined with lane-iota selects.  The selects ride the idle VALU
        # slots of this DMA-bound kernel; only ONE dense vst stream hits the output.
        x = x_ref[...]
        if len(group_bounds) == 1:
            shifted = _shift_with_zeros(x, shifts[0], shift_axis)
            o_ref[...] = jnp.zeros(blk, o_ref.dtype) if shifted is None else shifted
            return
        c_idx = lax.broadcasted_iota(jnp.int32, blk, cax)
        out = jnp.zeros(blk, o_ref.dtype)
        for (c0, c1), s in zip(group_bounds, shifts):
            shifted = _shift_with_zeros(x, s, shift_axis)
            if shifted is None:         # group shifted entirely out of range -> stays 0
                continue
            in_group = (c_idx >= c0) & (c_idx < c1)
            out = jnp.where(in_group, shifted, out)
        o_ref[...] = out
        return

    # Windowed ref->ref copy per channel group.  Used when group boundaries are
    # 128-lane aligned (stores already dense) and for the dim==3 (shift-along-W) path
    # where the offsets land on the sublane axis.
    # TODO(synk): if bundle dumps show sublane relayout copies / store-slot pressure on
    # the dim==3 path, re-implement it as pltpu.roll along the sublane axis with a
    # masked zero-fill folded into a lane-select combine.
    for (c0, c1), s in zip(group_bounds, shifts):
        grp = [slice(0, blk[i]) for i in range(ndim)]
        grp[cax] = slice(c0, c1)

        if s == 0:
            o_ref[tuple(grp)] = x_ref[tuple(grp)]
            continue

        keep = size - abs(s)
        if keep <= 0:                   # group shifted entirely out of range
            zshape = tuple(sl.stop - sl.start for sl in grp)
            o_ref[tuple(grp)] = jnp.zeros(zshape, o_ref.dtype)
            continue

        src, dst, zfill = list(grp), list(grp), list(grp)
        if s > 0:
            src[shift_axis] = slice(0, keep)
            dst[shift_axis] = slice(s, size)
            zfill[shift_axis] = slice(0, s)
        else:
            src[shift_axis] = slice(-s, size)
            dst[shift_axis] = slice(0, keep)
            zfill[shift_axis] = slice(keep, size)

        o_ref[tuple(dst)] = x_ref[tuple(src)]
        zshape = tuple(sl.stop - sl.start for sl in zfill)
        o_ref[tuple(zfill)] = jnp.zeros(zshape, o_ref.dtype)


# ----------------------------------------------------------------------------
# Wrapper
# ----------------------------------------------------------------------------
def _pick_tile(full, budget_tile, multiple, min_tiles):
    """Pick a tile size along one axis.

    Candidates are divisors of `full` that are multiples of `multiple` (or equal to
    `full`).  Prefer the largest candidate that fits the byte budget AND yields at
    least `min_tiles` blocks (v7x 2-TC parallelism); otherwise the largest in-budget
    candidate; otherwise the smallest legal candidate (the caller scales
    vmem_limit_bytes with the ACTUAL block so the fallback cannot silently OOM the
    scoped VMEM limit).
    """
    cands = [t for t in range(1, full + 1)
             if full % t == 0 and (t == full or t % multiple == 0)]
    within = [t for t in cands if t <= budget_tile]
    if not within:
        within = [min(cands)]
    enough = [t for t in within if full // t >= min_tiles]
    return max(enough) if enough else max(within)


def shifted_block(x, patch, dim, shift_size=5, *, block_bytes=8 * _MIB):
    """Pallas equivalent of ShiftedBlock(dim, shift_size).forward(x, patch).

    x: (B, N, C) with N == prod(patch).  `dim` is the roll axis of the NCHW-style
    (B, C, *patch) tensor (2 -> H, 3 -> W).  Returns (B, N, C).  Dtype-preserving.
    """
    # TODO(synk): highest-leverage change (per review) is to fuse this shift into the
    # consumer (UNeXt fc1 / DWConv) LHS tile loads; standalone it costs a full HBM
    # read + write of the activation tensor.
    B, N, C = x.shape
    assert len(patch) == 2, "only 2-D patches are supported"
    H, W = patch
    assert N == H * W, "N must equal prod(patch)"
    assert dim in (2, 3), "dim indexes (B, C, H, W): 2 -> H, 3 -> W"

    pad = shift_size // 2
    # torch.chunk(xn, shift_size, 1): chunk width ceil(C / shift_size), possibly fewer
    # than shift_size chunks; zip() truncates the shift list to match.
    split = -(-C // shift_size)
    group_bounds = tuple((c, min(c + split, C)) for c in range(0, C, split))
    shifts = tuple(range(-pad, pad + 1))[: len(group_bounds)]

    shift_axis = dim - 1                  # (B, H, W, C) axis: 1 -> H, 2 -> W
    x_sp = x.reshape(B, H, W, C)          # free reshape, no data movement
    itemsize = x.dtype.itemsize
    # bf16 packs 2 rows / int8 packs 4 rows per sublane: min sublane tile 8/16/32.
    sublane_mult = 8 * max(1, 4 // itemsize)
    min_tiles = -(-_MIN_GRID_STEPS // B)  # ceil(4 / B) spatial tiles for 2-TC v7x

    if shift_axis == 1:
        # Shift along H (outer block dim): keep H whole, tile W (the sublane dim).
        budget = max(1, block_bytes // (H * C * itemsize))
        wb = _pick_tile(W, budget, sublane_mult, min_tiles)
        block_shape = (1, H, wb, C)
        grid = (B, W // wb)
        index_map = lambda b, t: (b, 0, t, 0)
    else:
        # Shift along W (sublane dim): keep W whole, tile H (outer dim, any size).
        budget = max(1, block_bytes // (W * C * itemsize))
        hb = _pick_tile(H, budget, 1, min_tiles)
        block_shape = (1, hb, W, C)
        grid = (B, H // hb)
        index_map = lambda b, t: (b, t, 0, 0)

    # Select-combine only pays off when channel-group boundaries are NOT 128-lane
    # aligned (otherwise the windowed copies are already dense stores).  The dim==3
    # path keeps windowed copies for now (see TODO in the kernel).
    interior = [b0 for (b0, _) in group_bounds[1:]]
    lane_aligned = all(b % 128 == 0 for b in interior)
    select_combine = (shift_axis == 1) and (not lane_aligned) and len(group_bounds) > 1

    # Scale the scoped-VMEM limit with the ACTUAL block: in + out, double buffered,
    # plus headroom for Mosaic internal scratch / select-path temporaries.  With the
    # 8 MiB default this is 40 MiB -- safe on v7x (64 MiB VMEM) and v5e/v6e (128 MiB).
    actual_block_bytes = math.prod(block_shape) * itemsize
    vmem_limit = max(32 * _MIB, 4 * actual_block_bytes + 8 * _MIB)

    kernel = functools.partial(
        _shifted_block_kernel,
        group_bounds=group_bounds,
        shifts=shifts,
        shift_axis=shift_axis,
        select_combine=select_combine,
    )

    out_sp = pl.pallas_call(
        kernel,
        grid=grid,
        in_specs=[pl.BlockSpec(block_shape, index_map)],
        out_specs=pl.BlockSpec(block_shape, index_map),
        out_shape=jax.ShapeDtypeStruct(x_sp.shape, x.dtype),
        compiler_params=pltpu.CompilerParams(
            dimension_semantics=("parallel", "parallel"),
            vmem_limit_bytes=vmem_limit,
        ),
        cost_estimate=pl.CostEstimate(
            flops=0,
            transcendentals=0,
            bytes_accessed=2 * x.size * itemsize,
        ),
    )(x_sp)

    return out_sp.reshape(B, N, C)


# ----------------------------------------------------------------------------
# Reference (direct numpy transcription of the PyTorch forward)
# ----------------------------------------------------------------------------
def ref_shifted_block_numpy(x, patch, dim, shift_size=5):
    B, N, C = x.shape
    pad = shift_size // 2
    xn = np.transpose(x, (0, 2, 1)).reshape(B, C, *patch)
    pad_width = [(0, 0), (0, 0)] + [(pad, pad)] * len(patch)
    xn = np.pad(xn, pad_width, mode="constant")
    split = -(-C // shift_size)
    chunks = [xn[:, c:c + split] for c in range(0, C, split)]
    x_shift = [np.roll(xc, s, axis=dim) for xc, s in zip(chunks, range(-pad, pad + 1))]
    x_cat = np.concatenate(x_shift, axis=1)
    slicer = [slice(None), slice(None)] + [slice(pad, pad + p) for p in patch]
    x_cat = x_cat[tuple(slicer)]
    return x_cat.reshape(B, C, -1).transpose(0, 2, 1)


if __name__ == "__main__":
    key = jax.random.PRNGKey(0)

    # (B, C, patch, dim, shift_size, dtype, block_bytes).  Small block_bytes values
    # force multi-tile grids so the pipelined paths are exercised.
    cases = [
        (2, 10, (16, 16), 2, 5, jnp.float32, 8 * _MIB),   # select-combine, 5 narrow groups
        (2, 8,  (32, 64), 2, 5, jnp.float32, 16 * 1024),  # tiny blocks -> tiled along W
        (2, 7,  (16, 16), 2, 5, jnp.float32, 8 * _MIB),   # ragged torch.chunk (4 groups)
        (1, 12, (16, 16), 3, 5, jnp.float32, 8 * _MIB),   # shift along W (sublane path), B=1
        (2, 16, (16, 64), 2, 5, jnp.bfloat16, 8 * 1024),  # bf16 -> sublane multiple 16
        (2, 256, (8, 16), 2, 2, jnp.float32, 8 * _MIB),   # 128-aligned groups -> windowed path
    ]
    for B, C, patch, dim, shift_size, dtype, bb in cases:
        N = patch[0] * patch[1]
        key, sub = jax.random.split(key)
        x = jax.random.normal(sub, (B, N, C), dtype=jnp.float32).astype(dtype)
        out = jax.block_until_ready(
            shifted_block(x, patch, dim, shift_size=shift_size, block_bytes=bb))
        ref = ref_shifted_block_numpy(
            np.asarray(x, dtype=np.float32), patch, dim, shift_size=shift_size)
        np.testing.assert_array_equal(np.asarray(out, dtype=np.float32), ref)

    print("KERNEL_OK")
</pallas_src>

<mosaic_0001>
module attributes {stable_mosaic.version = 11 : i64} {
  func.func @_shifted_block_kernel(%arg0: i32, %arg1: i32, %arg2: memref<1x16x8x10xf32, #tpu.memory_space<vmem>>, %arg3: memref<1x16x8x10xf32, #tpu.memory_space<vmem>>) attributes {dimension_semantics = [#tpu.dimension_semantics<parallel>, #tpu.dimension_semantics<parallel>], iteration_bounds = array<i64: 2, 2>, scalar_prefetch = 0 : i64, scratch_operands = 0 : i64, tpu.core_type = #tpu.core_type<tc>, window_params = [{transform_indices = @transform_0, window_bounds = array<i64: 1, 16, 8, 10>}, {transform_indices = @transform_1, window_bounds = array<i64: 1, 16, 8, 10>}]} {
    %c0 = arith.constant 0 : index
    %c0_0 = arith.constant 0 : index
    %c0_1 = arith.constant 0 : index
    %c0_2 = arith.constant 0 : index
    %0 = vector.load %arg2[%c0, %c0_0, %c0_1, %c0_2] : memref<1x16x8x10xf32, #tpu.memory_space<vmem>>, vector<1x16x8x10xf32>
    %1 = tpu.iota {dimensions = array<i32: 3>} : vector<1x16x8x10xi32>
    %cst = arith.constant 0.000000e+00 : f32
    %2 = vector.broadcast %cst : f32 to vector<1x16x8x10xf32>
    %cst_3 = arith.constant 0.000000e+00 : f32
    %3 = vector.broadcast %cst_3 : f32 to vector<1x2x8x10xf32>
    %4 = vector.extract_strided_slice %0 {offsets = [0, 2, 0, 0], sizes = [1, 14, 8, 10], strides = [1, 1, 1, 1]} : vector<1x16x8x10xf32> to vector<1x14x8x10xf32>
    %5 = tpu.concatenate %4, %3 in 1 : vector<1x14x8x10xf32>, vector<1x2x8x10xf32> -> vector<1x16x8x10xf32>
    %c0_i32 = arith.constant 0 : i32
    %6 = vector.broadcast %c0_i32 : i32 to vector<1x16x8x10xi32>
    %7 = arith.cmpi sge, %1, %6 : vector<1x16x8x10xi32>
    %c2_i32 = arith.constant 2 : i32
    %8 = vector.broadcast %c2_i32 : i32 to vector<1x16x8x10xi32>
    %9 = arith.cmpi slt, %1, %8 : vector<1x16x8x10xi32>
    %10 = arith.andi %7, %9 : vector<1x16x8x10xi1>
    %11 = arith.select %10, %5, %2 : vector<1x16x8x10xi1>, vector<1x16x8x10xf32>
    %cst_4 = arith.constant 0.000000e+00 : f32
    %12 = vector.broadcast %cst_4 : f32 to vector<1x1x8x10xf32>
    %13 = vector.extract_strided_slice %0 {offsets = [0, 1, 0, 0], sizes = [1, 15, 8, 10], strides = [1, 1, 1, 1]} : vector<1x16x8x10xf32> to vector<1x15x8x10xf32>
    %14 = tpu.concatenate %13, %12 in 1 : vector<1x15x8x10xf32>, vector<1x1x8x10xf32> -> vector<1x16x8x10xf32>
    %c2_i32_5 = arith.constant 2 : i32
    %15 = vector.broadcast %c2_i32_5 : i32 to vector<1x16x8x10xi32>
    %16 = arith.cmpi sge, %1, %15 : vector<1x16x8x10xi32>
    %c4_i32 = arith.constant 4 : i32
    %17 = vector.broadcast %c4_i32 : i32 to vector<1x16x8x10xi32>
    %18 = arith.cmpi slt, %1, %17 : vector<1x16x8x10xi32>
    %19 = arith.andi %16, %18 : vector<1x16x8x10xi1>
    %20 = arith.select %19, %14, %11 : vector<1x16x8x10xi1>, vector<1x16x8x10xf32>
    %c4_i32_6 = arith.constant 4 : i32
    %21 = vector.broadcast %c4_i32_6 : i32 to vector<1x16x8x10xi32>
    %22 = arith.cmpi sge, %1, %21 : vector<1x16x8x10xi32>
    %c6_i32 = arith.constant 6 : i32
    %23 = vector.broadcast %c6_i32 : i32 to vector<1x16x8x10xi32>
    %24 = arith.cmpi slt, %1, %23 : vector<1x16x8x10xi32>
    %25 = arith.andi %22, %24 : vector<1x16x8x10xi1>
    %26 = arith.select %25, %0, %20 : vector<1x16x8x10xi1>, vector<1x16x8x10xf32>
    %cst_7 = arith.constant 0.000000e+00 : f32
    %27 = vector.broadcast %cst_7 : f32 to vector<1x1x8x10xf32>
    %28 = vector.extract_strided_slice %0 {offsets = [0, 0, 0, 0], sizes = [1, 15, 8, 10], strides = [1, 1, 1, 1]} : vector<1x16x8x10xf32> to vector<1x15x8x10xf32>
    %29 = tpu.concatenate %27, %28 in 1 : vector<1x1x8x10xf32>, vector<1x15x8x10xf32> -> vector<1x16x8x10xf32>
    %c6_i32_8 = arith.constant 6 : i32
    %30 = vector.broadcast %c6_i32_8 : i32 to vector<1x16x8x10xi32>
    %31 = arith.cmpi sge, %1, %30 : vector<1x16x8x10xi32>
    %c8_i32 = arith.constant 8 : i32
    %32 = vector.broadcast %c8_i32 : i32 to vector<1x16x8x10xi32>
    %33 = arith.cmpi slt, %1, %32 : vector<1x16x8x10xi32>
    %34 = arith.andi %31, %33 : vector<1x16x8x10xi1>
    %35 = arith.select %34, %29, %26 : vector<1x16x8x10xi1>, vector<1x16x8x10xf32>
    %cst_9 = arith.constant 0.000000e+00 : f32
    %36 = vector.broadcast %cst_9 : f32 to vector<1x2x8x10xf32>
    %37 = vector.extract_strided_slice %0 {offsets = [0, 0, 0, 0], sizes = [1, 14, 8, 10], strides = [1, 1, 1, 1]} : vector<1x16x8x10xf32> to vector<1x14x8x10xf32>
    %38 = tpu.concatenate %36, %37 in 1 : vector<1x2x8x10xf32>, vector<1x14x8x10xf32> -> vector<1x16x8x10xf32>
    %c8_i32_10 = arith.constant 8 : i32
    %39 = vector.broadcast %c8_i32_10 : i32 to vector<1x16x8x10xi32>
    %40 = arith.cmpi sge, %1, %39 : vector<1x16x8x10xi32>
    %c10_i32 = arith.constant 10 : i32
    %41 = vector.broadcast %c10_i32 : i32 to vector<1x16x8x10xi32>
    %42 = arith.cmpi slt, %1, %41 : vector<1x16x8x10xi32>
    %43 = arith.andi %40, %42 : vector<1x16x8x10xi1>
    %44 = arith.select %43, %38, %35 : vector<1x16x8x10xi1>, vector<1x16x8x10xf32>
    %c0_11 = arith.constant 0 : index
    %c0_12 = arith.constant 0 : index
    %c0_13 = arith.constant 0 : index
    %c0_14 = arith.constant 0 : index
    %45 = vector.load %arg3[%c0_11, %c0_12, %c0_13, %c0_14] : memref<1x16x8x10xf32, #tpu.memory_space<vmem>>, vector<1x16x8x10xf32>
    tpu.vector_store %arg3[%c0_11, %c0_12, %c0_13, %c0_14], %44 {strides = array<i32>} : memref<1x16x8x10xf32, #tpu.memory_space<vmem>>, vector<1x16x8x10xf32>,
    return
  }
  func.func @transform_0(%arg0: i32, %arg1: i32) -> (i32, i32, i32, i32) {
    %c0_i32 = arith.constant 0 : i32
    %c0_i32_0 = arith.constant 0 : i32
    %c0_i32_1 = arith.constant 0 : i32
    return %arg0, %c0_i32, %arg1, %c0_i32_0 : i32, i32, i32, i32
  }
  func.func @transform_1(%arg0: i32, %arg1: i32) -> (i32, i32, i32, i32) {
    %c0_i32 = arith.constant 0 : i32
    %c0_i32_0 = arith.constant 0 : i32
    %c0_i32_1 = arith.constant 0 : i32
    return %arg0, %c0_i32, %arg1, %c0_i32_0 : i32, i32, i32, i32
  }
}

</mosaic_0001>

<bundles_post_ra>
// kernel: tpu_custom_call.1
= control target key start
LH: loop header
LB: loop body
LE: loop exit
PB: predicated region body
PF: predicated region fallthrough
CT: control target
= control target key end

     0   :  { %s664_s6 = smov 0   ;;  %s666_s7 = smov 0   ;;  %s1066_s0 = inlined_call_operand.vmem [shape: f32[2,16,16,10], index: 0, kind: input, shape index: {}]   ;;  %s1067_s1 = inlined_call_operand.vmem [shape: f32[2,16,16,10], index: 1, kind: output, shape index: {}]  }
   0x1   :  { %s668_s8 = smov 0   ;;  %s670_s9 = smov 0  }
   0x2   :  { %s672_s10 = smov 0   ;;  %s674_s11 = smov 0  }
   0x3   :  { %s676_s12 = smov 0  }
   0x4 LB: > { %s20_s13 = sadd.s32 1, %s644_s10  ;;  %s23_s14 = sadd.s32 1, %s648_s11  ;;  %s652_s12 = sphi %s676_s12, %s11_s12   ;;  %s648_s11 = sphi %s674_s11, %s1082_s11   ;;  %s644_s10 = sphi %s672_s10, %s1081_s10   ;;  %s640_s9 = sphi %s670_s9, %s1080_s9   ;;  %s636_s8 = sphi %s668_s8, %s1079_s8   ;;  %s632_s7 = sphi %s666_s7, %s1078_s7   ;;  %s628_s6 = sphi %s664_s6, %s1077_s6  }
   0x5   : > { %p21_p0 = scmp.ge.s32.totalorder %s20_s13, 2  ;;  %s527_s15 = sadd.s32 4294967295, %s652_s12  }
   0x6   : > { %p39_p1 = scmp.ne.s32.totalorder %s632_s7, %s628_s6  ;;  %p40_p2 = scmp.eq.s32.totalorder %s652_s12, 0 }
   0x7   : > { %s1084_s13 = smov (%p21_p0, %s20_s13), 0  ;;  %s1086_s14 = smov (!%p21_p0, %s23_s14), %s648_s11 }
   0x8   : > { %p25_p3 = scmp.ge.s32.totalorder %s1086_s14, 2  ;;  %p71_p4 = scmp.eq.s32.totalorder %s527_s15, 3 }
   0x9   : > { %s28_s16 = ssub.s32 %s644_s10, %s1084_s13  ;;  %p41_p5 = por %p40_p2, %p39_p1 }
   0xa   : > { %s1088_s14 = smov (%p25_p3, %s1086_s14), 0  ;;  %p712_p6 = por %p71_p4, %p39_p1 }
   0xb   : > { %s27_s18 = ssub.s32 %s648_s11, %s1088_s14  ;;  %s32_s20 = sadd.s32 1, %s632_s7 }
   0xc   : > { %s29_s19 = sor.u32 %s28_s16, %s27_s18  ;;  %p530_p8 = scmp.ge.s32.totalorder %s652_s12, 4 }
   0xd   : > { %p30_p7 = scmp.eq.s32.totalorder %s29_s19, 0 }
   0xe   : > { %93 = sbr.rel (%p530_p8) target bundleno = 33 (0x21), region = 16 }
   0xf   : > { %s720_s21 = scalar_select %p30_p7, %s632_s7, %s32_s20  }
  0x13   : > { %96 = sbr.rel (!%p41_p5) target bundleno = 33 (0x21), region = 20  ;;  %s98_s22 = sand.u32 (%p41_p5), 1, %s632_s7  }
  0x14   : > { %s532_s23 = sshll.u32 (%p41_p5), %s648_s11, 5  ;;  %s531_s24 = sshll.u32 (%p41_p5), %s98_s22, 7 }
  0x15   : > { %s102_s25 = sadd.s32 (%p41_p5), %s644_s10, %s532_s23  ;;  %s100_s30 = scalar_lea.vmem (%p41_p5), [#allocation2], %s531_s24 }
  0x16   : > { %s533_s26 = sshll.u32 (%p41_p5), %s102_s25, 3 }
  0x17   : > { %s729_s29 = scalar_lea.vmem (%p41_p5), %s1066_s0, %s533_s26 }
  0x18   : > { %v163_v0 = vld [vmem:[%s729_s29] sm:$0xff]  ;;  %v165_v1 = vld [vmem:[%s729_s29 + $0x10] sm:$0xff] }
  0x19   : > { %v167_v2 = vld [vmem:[%s729_s29 + $0x20] sm:$0xff]  ;;  %164 = vst [vmem:[%s100_s30] sm:$0xff] %v163_v0  ;;  %166 = vst [vmem:[%s100_s30 + $0x8] sm:$0xff] %v165_v1  ;;  %v169_v3 = vld [vmem:[%s729_s29 + $0x30] sm:$0xff] }
  0x1a   : > { %168 = vst [vmem:[%s100_s30 + $0x10] sm:$0xff] %v167_v2  ;;  %v171_v4 = vld [vmem:[%s729_s29 + $0x40] sm:$0xff]  ;;  %v173_v5 = vld [vmem:[%s729_s29 + $0x50] sm:$0xff]  ;;  %170 = vst [vmem:[%s100_s30 + $0x18] sm:$0xff] %v169_v3 }
  0x1b   : > { %172 = vst [vmem:[%s100_s30 + $0x20] sm:$0xff] %v171_v4  ;;  %174 = vst [vmem:[%s100_s30 + $0x28] sm:$0xff] %v173_v5  ;;  %v175_v6 = vld [vmem:[%s729_s29 + $0x60] sm:$0xff]  ;;  %v177_v7 = vld [vmem:[%s729_s29 + $0x70] sm:$0xff] }
  0x1c   : > { %v179_v8 = vld [vmem:[%s729_s29 + $0x80] sm:$0xff]  ;;  %176 = vst [vmem:[%s100_s30 + $0x30] sm:$0xff] %v175_v6  ;;  %178 = vst [vmem:[%s100_s30 + $0x38] sm:$0xff] %v177_v7  ;;  %v181_v9 = vld [vmem:[%s729_s29 + $0x90] sm:$0xff] }
  0x1d   : > { %180 = vst [vmem:[%s100_s30 + $0x40] sm:$0xff] %v179_v8  ;;  %v183_v10 = vld [vmem:[%s729_s29 + $0xa0] sm:$0xff]  ;;  %v185_v11 = vld [vmem:[%s729_s29 + $0xb0] sm:$0xff]  ;;  %182 = vst [vmem:[%s100_s30 + $0x48] sm:$0xff] %v181_v9 }
  0x1e   : > { %184 = vst [vmem:[%s100_s30 + $0x50] sm:$0xff] %v183_v10  ;;  %186 = vst [vmem:[%s100_s30 + $0x58] sm:$0xff] %v185_v11  ;;  %v187_v12 = vld [vmem:[%s729_s29 + $0xc0] sm:$0xff]  ;;  %v189_v13 = vld [vmem:[%s729_s29 + $0xd0] sm:$0xff] }
  0x1f   : > { %v191_v14 = vld [vmem:[%s729_s29 + $0xe0] sm:$0xff]  ;;  %188 = vst [vmem:[%s100_s30 + $0x60] sm:$0xff] %v187_v12  ;;  %190 = vst [vmem:[%s100_s30 + $0x68] sm:$0xff] %v189_v13  ;;  %v193_v15 = vld [vmem:[%s729_s29 + $0xf0] sm:$0xff] }
  0x20   : > { %192 = vst [vmem:[%s100_s30 + $0x70] sm:$0xff] %v191_v14  ;;  %194 = vst [vmem:[%s100_s30 + $0x78] sm:$0xff] %v193_v15 }
  0x21 PF: > { %p534_p9 = scmp.ge.s32.totalorder %s652_s12, 1  ;;  %p199_p10 = scmp.lt.s32.totalorder %s652_s12, 5 }
  0x23   : > { %p200_p11 = pnand %p534_p9, %p199_p10 }
  0x24   : > { %s206_s2 = sand.u32 (!%p200_p11), 1, %s628_s6  }
  0x25   : > { %203 = sbr.rel (%p200_p11) target bundleno = 77 (0x4d), region = 58  ;;  %s750_s3 = sshll.u32 (!%p200_p11), %s206_s2, 7 }
  0x26   : > { %s755_s4 = scalar_lea.vmem (!%p200_p11), [#allocation2], %s750_s3  ;;  %s835_s5 = scalar_lea.vmem (!%p200_p11), [#allocation3], %s750_s3 }
  0x2a   : > { %v240_v16 = vlaneseq  ;;  %v224_v18 = vld [vmem:[%s755_s4] sm:$0xff]  ;;  %v225_v19 = vld [vmem:[%s755_s4 + $0x8] sm:$0xff]  ;;  %v226_v20 = vld [vmem:[%s755_s4 + $0x10] sm:$0xff]  ;;  %vm334_vm0 = vcmask 80896   ;;  %s538_s6 = sshll.u32 (%p712_p6), %s640_s9, 5 }
  0x2b   : > { %v227_v21 = vld [vmem:[%s755_s4 + $0x18] sm:$0xff]  ;;  %v766_v22 = vld [vmem:[%s755_s4 + $0x20] sm:$0xff]  ;;  %v229_v25 = vld [vmem:[%s755_s4 + $0x28] sm:$0xff]  ;;  %s359_s15 = sadd.s32 (%p712_p6), %s636_s8, %s538_s6 }
  0x2c   : > { %v752_v17 = vand.u32 127, %v240_v16  ;;  %v802_v34 = vld [vmem:[%s755_s4 + $0x30] sm:$0xff]  ;;  %v818_v40 = vld [vmem:[%s755_s4 + $0x38] sm:$0xff]  ;;  %v829_v45 = vld [vmem:[%s755_s4 + $0x40] sm:$0xff]  ;;  %s539_s16 = sshll.u32 (%p712_p6), %s359_s15, 3 }
  0x2d   : > { %v832_v46 = vld [vmem:[%s755_s4 + $0x48] sm:$0xff]  ;;  %v234_v59 = vld [vmem:[%s755_s4 + $0x50] sm:$0xff]  ;;  %v235_v0 = vld [vmem:[%s755_s4 + $0x58] sm:$0xff]  ;;  %s361_s19 = scalar_lea.vmem (%p712_p6), %s1067_s1, %s539_s16 }
  0x2e   : > { %vm243_vm1 = vcmp.lt.s32.totalorder %v752_v17, 2  ;;  %vm259_vm2 = vcmp.ge.s32.totalorder %v752_v17, 2  ;;  %vm260_vm3 = vcmp.lt.s32.totalorder %v752_v17, 4  ;;  %vm277_vm4 = vcmp.ge.s32.totalorder %v752_v17, 4  ;;  %v236_v5 = vld [vmem:[%s755_s4 + $0x60] sm:$0xff]  ;;  %v237_v6 = vld [vmem:[%s755_s4 + $0x68] sm:$0xff] }
  0x2f   : > { %v245_v23 = vsel %vm243_vm1, %v226_v20, 0.0  ;;  %vm770_vm5 = vmand %vm259_vm2, %vm260_vm3  ;;  %vm278_vm6 = vcmp.lt.s32.totalorder %v752_v17, 6  ;;  %vm296_vm7 = vcmp.ge.s32.totalorder %v752_v17, 6  ;;  %vm297_vm8 = vcmp.lt.s32.totalorder %v752_v17, 8 }
  0x30   : > { %v262_v26 = vsel %vm770_vm5, %v225_v19, %v245_v23  ;;  %vm780_vm9 = vmand %vm277_vm4, %vm278_vm6  ;;  %vm315_vm10 = vcmp.ge.s32.totalorder %v752_v17, 8  ;;  %vm316_vm11 = vcmp.lt.s32.totalorder %v752_v17, 10  ;;  %v246_v28 = vsel %vm243_vm1, %v227_v21, 0.0 }
  0x31   : > { %v280_v29 = vsel %vm780_vm9, %v224_v18, %v262_v26  ;;  %vm790_vm12 = vmand %vm296_vm7, %vm297_vm8  ;;  %v263_v31 = vsel %vm770_vm5, %v226_v20, %v246_v28  ;;  %v247_v32 = vsel %vm243_vm1, %v766_v22, 0.0  ;;  %v248_v33 = vsel %vm243_vm1, %v229_v25, 0.0  ;;  %v239_v26 = vld [vmem:[%s755_s4 + $0x78] sm:$0xff] }
  0x32   : > { %v299_v35 = vsel %vm790_vm12, 0.0, %v280_v29  ;;  %vm806_vm13 = vmand %vm315_vm10, %vm316_vm11  ;;  %v281_v37 = vsel %vm780_vm9, %v225_v19, %v263_v31  ;;  %v264_v38 = vsel %vm770_vm5, %v227_v21, %v247_v32  ;;  %v265_v39 = vsel %vm770_vm5, %v766_v22, %v248_v33 }
  0x33   : > { %v318_v41 = vsel %vm806_vm13, 0.0, %v299_v35  ;;  %v300_v42 = vsel %vm790_vm12, %v224_v18, %v281_v37  ;;  %v282_v43 = vsel %vm780_vm9, %v226_v20, %v264_v38  ;;  %v283_v44 = vsel %vm780_vm9, %v227_v21, %v265_v39 }
  0x34   : > { %335 = vst.msk [vmem:[%s835_s5] sm:$0xff] %vm334_vm0, %v318_v41  ;;  %v319_v47 = vsel %vm806_vm13, 0.0, %v300_v42  ;;  %v301_v48 = vsel %vm790_vm12, %v225_v19, %v282_v43  ;;  %v302_v49 = vsel %vm790_vm12, %v226_v20, %v283_v44  ;;  %v249_v50 = vsel %vm243_vm1, %v802_v34, 0.0 }
  0x35   : > { %336 = vst.msk [vmem:[%s835_s5 + $0x8] sm:$0xff] %vm334_vm0, %v319_v47  ;;  %v320_v51 = vsel %vm806_vm13, %v224_v18, %v301_v48  ;;  %v321_v52 = vsel %vm806_vm13, %v225_v19, %v302_v49  ;;  %v266_v53 = vsel %vm770_vm5, %v229_v25, %v249_v50  ;;  %v250_v54 = vsel %vm243_vm1, %v818_v40, 0.0 }
  0x36   : > { %337 = vst.msk [vmem:[%s835_s5 + $0x10] sm:$0xff] %vm334_vm0, %v320_v51  ;;  %338 = vst.msk [vmem:[%s835_s5 + $0x18] sm:$0xff] %vm334_vm0, %v321_v52  ;;  %v284_v55 = vsel %vm780_vm9, %v766_v22, %v266_v53  ;;  %v267_v56 = vsel %vm770_vm5, %v802_v34, %v250_v54  ;;  %v251_v57 = vsel %vm243_vm1, %v829_v45, 0.0  ;;  %v252_v58 = vsel %vm243_vm1, %v832_v46, 0.0 }
  0x37   : > { %v303_v60 = vsel %vm790_vm12, %v227_v21, %v284_v55  ;;  %v285_v61 = vsel %vm780_vm9, %v229_v25, %v267_v56  ;;  %v268_v62 = vsel %vm770_vm5, %v818_v40, %v251_v57  ;;  %v269_v63 = vsel %vm770_vm5, %v829_v45, %v252_v58 }
  0x38   : > { %v322_v1 = vsel %vm806_vm13, %v226_v20, %v303_v60  ;;  %v304_v2 = vsel %vm790_vm12, %v766_v22, %v285_v61  ;;  %v286_v3 = vsel %vm780_vm9, %v802_v34, %v268_v62  ;;  %v287_v4 = vsel %vm780_vm9, %v818_v40, %v269_v63  ;;  %v238_v20 = vld [vmem:[%s755_s4 + $0x70] sm:$0xff] }
  0x39   : > { %339 = vst.msk [vmem:[%s835_s5 + $0x20] sm:$0xff] %vm334_vm0, %v322_v1  ;;  %v323_v7 = vsel %vm806_vm13, %v227_v21, %v304_v2  ;;  %v305_v8 = vsel %vm790_vm12, %v229_v25, %v286_v3  ;;  %v306_v9 = vsel %vm790_vm12, %v802_v34, %v287_v4  ;;  %v253_v10 = vsel %vm243_vm1, %v234_v59, 0.0 }
  0x3a   : > { %340 = vst.msk [vmem:[%s835_s5 + $0x28] sm:$0xff] %vm334_vm0, %v323_v7  ;;  %v324_v11 = vsel %vm806_vm13, %v766_v22, %v305_v8  ;;  %v325_v12 = vsel %vm806_vm13, %v229_v25, %v306_v9  ;;  %v270_v13 = vsel %vm770_vm5, %v832_v46, %v253_v10  ;;  %v254_v14 = vsel %vm243_vm1, %v235_v0, 0.0 }
  0x3b   : > { %341 = vst.msk [vmem:[%s835_s5 + $0x30] sm:$0xff] %vm334_vm0, %v324_v11  ;;  %342 = vst.msk [vmem:[%s835_s5 + $0x38] sm:$0xff] %vm334_vm0, %v325_v12  ;;  %v288_v15 = vsel %vm780_vm9, %v829_v45, %v270_v13  ;;  %v271_v16 = vsel %vm770_vm5, %v234_v59, %v254_v14  ;;  %v255_v18 = vsel %vm243_vm1, %v236_v5, 0.0  ;;  %v256_v19 = vsel %vm243_vm1, %v237_v6, 0.0  ;;  %v420_v30 = vld [vmem:[%s835_s5] sm:$0xff] (%p712_p6) }
  0x3c   : > { %v307_v21 = vsel %vm790_vm12, %v818_v40, %v288_v15  ;;  %v289_v22 = vsel %vm780_vm9, %v832_v46, %v271_v16  ;;  %v272_v23 = vsel %vm770_vm5, %v235_v0, %v255_v18  ;;  %v273_v25 = vsel %vm770_vm5, %v236_v5, %v256_v19  ;;  %v422_v36 = vld [vmem:[%s835_s5 + $0x8] sm:$0xff] (%p712_p6)  ;;  %421 = vst [vmem:[%s361_s19] sm:$0xff] (%p712_p6), %v420_v30 }
  0x3d   : > { %v326_v28 = vsel %vm806_vm13, %v802_v34, %v307_v21  ;;  %v308_v29 = vsel %vm790_vm12, %v829_v45, %v289_v22  ;;  %v290_v31 = vsel %vm780_vm9, %v234_v59, %v272_v23  ;;  %v291_v32 = vsel %vm780_vm9, %v235_v0, %v273_v25  ;;  %v424_v53 = vld [vmem:[%s835_s5 + $0x10] sm:$0xff] (%p712_p6)  ;;  %v426_v54 = vld [vmem:[%s835_s5 + $0x18] sm:$0xff] (%p712_p6)  ;;  %423 = vst [vmem:[%s361_s19 + $0x10] sm:$0xff] (%p712_p6), %v422_v36 }
  0x3e   : > { %343 = vst.msk [vmem:[%s835_s5 + $0x40] sm:$0xff] %vm334_vm0, %v326_v28  ;;  %v327_v33 = vsel %vm806_vm13, %v818_v40, %v308_v29  ;;  %v309_v34 = vsel %vm790_vm12, %v832_v46, %v290_v31  ;;  %v310_v35 = vsel %vm790_vm12, %v234_v59, %v291_v32  ;;  %v257_v37 = vsel %vm243_vm1, %v238_v20, 0.0  ;;  %425 = vst [vmem:[%s361_s19 + $0x20] sm:$0xff] (%p712_p6), %v424_v53 }
  0x3f   : > { %344 = vst.msk [vmem:[%s835_s5 + $0x48] sm:$0xff] %vm334_vm0, %v327_v33  ;;  %v328_v38 = vsel %vm806_vm13, %v829_v45, %v309_v34  ;;  %v329_v39 = vsel %vm806_vm13, %v832_v46, %v310_v35  ;;  %v274_v40 = vsel %vm770_vm5, %v237_v6, %v257_v37  ;;  %v258_v41 = vsel %vm243_vm1, %v239_v26, 0.0  ;;  %427 = vst [vmem:[%s361_s19 + $0x30] sm:$0xff] (%p712_p6), %v426_v54 }
  0x40   : > { %345 = vst.msk [vmem:[%s835_s5 + $0x50] sm:$0xff] %vm334_vm0, %v328_v38  ;;  %346 = vst.msk [vmem:[%s835_s5 + $0x58] sm:$0xff] %vm334_vm0, %v329_v39  ;;  %v292_v42 = vsel %vm780_vm9, %v236_v5, %v274_v40  ;;  %v275_v43 = vsel %vm770_vm5, %v238_v20, %v258_v41  ;;  %v276_v44 = vsel %vm770_vm5, %v239_v26, 0.0  ;;  %v295_v17 = vsel %vm780_vm9, %v239_v26, 0.0  ;;  %357 = sbr.rel (!%p712_p6) target bundleno = 77 (0x4d), region = 66  ;;  %v428_v55 = vld [vmem:[%s835_s5 + $0x20] sm:$0xff] (%p712_p6) }
  0x41   : > { %v311_v45 = vsel %vm790_vm12, %v235_v0, %v292_v42  ;;  %v293_v46 = vsel %vm780_vm9, %v237_v6, %v275_v43  ;;  %v294_v47 = vsel %vm780_vm9, %v238_v20, %v276_v44  ;;  %v314_v48 = vsel %vm790_vm12, %v238_v20, %v295_v17  ;;  %v430_v56 = vld [vmem:[%s835_s5 + $0x28] sm:$0xff] (%p712_p6)  ;;  %429 = vst [vmem:[%s361_s19 + $0x40] sm:$0xff] (%p712_p6), %v428_v55 }
  0x42   : > { %v330_v24 = vsel %vm806_vm13, %v234_v59, %v311_v45  ;;  %v312_v49 = vsel %vm790_vm12, %v236_v5, %v293_v46  ;;  %v313_v50 = vsel %vm790_vm12, %v237_v6, %v294_v47  ;;  %v333_v51 = vsel %vm806_vm13, %v237_v6, %v314_v48  ;;  %v432_v57 = vld [vmem:[%s835_s5 + $0x30] sm:$0xff] (%p712_p6)  ;;  %v434_v58 = vld [vmem:[%s835_s5 + $0x38] sm:$0xff] (%p712_p6)  ;;  %431 = vst [vmem:[%s361_s19 + $0x50] sm:$0xff] (%p712_p6), %v430_v56 }
  0x43   : > { %347 = vst.msk [vmem:[%s835_s5 + $0x60] sm:$0xff] %vm334_vm0, %v330_v24  ;;  %v331_v27 = vsel %vm806_vm13, %v235_v0, %v312_v49  ;;  %v332_v52 = vsel %vm806_vm13, %v236_v5, %v313_v50  ;;  %350 = vst.msk [vmem:[%s835_s5 + $0x78] sm:$0xff] %vm334_vm0, %v333_v51 }
  0x44   : > { %348 = vst.msk [vmem:[%s835_s5 + $0x68] sm:$0xff] %vm334_vm0, %v331_v27  ;;  %349 = vst.msk [vmem:[%s835_s5 + $0x70] sm:$0xff] %vm334_vm0, %v332_v52 }
  0x45   : > { %v436_v59 = vld [vmem:[%s835_s5 + $0x40] sm:$0xff]  ;;  %433 = vst [vmem:[%s361_s19 + $0x60] sm:$0xff] %v432_v57  ;;  %435 = vst [vmem:[%s361_s19 + $0x70] sm:$0xff] %v434_v58 }
  0x46   : > { %v438_v60 = vld [vmem:[%s835_s5 + $0x48] sm:$0xff]  ;;  %437 = vst [vmem:[%s361_s19 + $0x80] sm:$0xff] %v436_v59 }
  0x47   : > { %v440_v61 = vld [vmem:[%s835_s5 + $0x50] sm:$0xff]  ;;  %v442_v62 = vld [vmem:[%s835_s5 + $0x58] sm:$0xff]  ;;  %439 = vst [vmem:[%s361_s19 + $0x90] sm:$0xff] %v438_v60 }
  0x48   : > { %441 = vst [vmem:[%s361_s19 + $0xa0] sm:$0xff] %v440_v61  ;;  %443 = vst [vmem:[%s361_s19 + $0xb0] sm:$0xff] %v442_v62 }
  0x4a   : > { %v444_v63 = vld [vmem:[%s835_s5 + $0x60] sm:$0xff]  ;;  %v450_v2 = vld [vmem:[%s835_s5 + $0x78] sm:$0xff] }
  0x4b   : > { %v446_v0 = vld [vmem:[%s835_s5 + $0x68] sm:$0xff]  ;;  %v448_v1 = vld [vmem:[%s835_s5 + $0x70] sm:$0xff]  ;;  %445 = vst [vmem:[%s361_s19 + $0xc0] sm:$0xff] %v444_v63  ;;  %451 = vst [vmem:[%s361_s19 + $0xf0] sm:$0xff] %v450_v2 }
  0x4c   : > { %447 = vst [vmem:[%s361_s19 + $0xd0] sm:$0xff] %v446_v0  ;;  %449 = vst [vmem:[%s361_s19 + $0xe0] sm:$0xff] %v448_v1 }
  0x4d PF: > { %s11_s12 = sadd.s32 1, %s652_s12   ;;  %s1077_s6 = smov %s632_s7 }
  0x4e   : > { %p8_p12 = scmp.ge.s32.totalorder %s11_s12, 6   ;;  %s1078_s7 = smov %s720_s21 }
  0x4f   : > { %s1079_s8 = smov %s644_s10  ;;  %s1080_s9 = smov %s648_s11 }
  0x50   : > { %s1081_s10 = smov %s1084_s13  ;;  %s1082_s11 = smov %s1088_s14 }
  0x51   :  { %10 = sbr.rel (!%p8_p12) target bundleno = 4 (0x4), region = 135 }

</bundles_post_ra>
